<compile_context>
chip_gen: v7x
topology: tpu7x:2x2x1
jax: 0.10.0
libtpu: 0.0.40
codegen_flags: <defaults>
</compile_context>

<pallas_src>
import jax
import jax.numpy as jnp
from jax.experimental import pallas as pl
from jax.experimental.pallas import tpu as pltpu


def swin_embedding_kernel(x_ref, w_ref, b_ref, gamma_ref, beta_ref, o_ref):
    # x_ref: (TM, K) flattened patches          (one M-tile)
    # w_ref: (K, C) conv weight reshaped         (resident across grid)
    # b_ref / gamma_ref / beta_ref: (1, C)       (resident across grid)
    # o_ref: (TM, C)

    # Patch-embedding "conv" == matmul on the MXU, accumulate in f32.
    y = jnp.dot(x_ref[...], w_ref[...], preferred_element_type=jnp.float32)
    y = y + b_ref[...]

    # LayerNorm over the channel dim (biased variance, eps matches nn.LayerNorm).
    mean = jnp.mean(y, axis=-1, keepdims=True)
    centered = y - mean
    var = jnp.mean(centered * centered, axis=-1, keepdims=True)
    y = centered * jax.lax.rsqrt(var + 1e-5)
    y = y * gamma_ref[...] + beta_ref[...]

    # ReLU
    o_ref[...] = jnp.maximum(y, 0.0).astype(o_ref.dtype)


def swin_embedding(x, conv_w, conv_b, ln_gamma, ln_beta, patch_size=4, block_m=1024):
    """x: (B, 3, H, W) float32 (NCHW, like the PyTorch module).
    conv_w: (C, 3, p, p), conv_b/ln_gamma/ln_beta: (C,).
    Returns (B, (H/p)*(W/p), C)."""
    B, Cin, H, W = x.shape
    C = conv_w.shape[0]
    p = patch_size
    assert H % p == 0 and W % p == 0, "H and W must be divisible by patch_size"
    Hp, Wp = H // p, W // p
    K = Cin * p * p
    M = B * Hp * Wp

    # --- glue (plain JAX): extract non-overlapping patches, flatten as (c_in, kh, kw).
    # allow_input_fusion below lets XLA fuse this transpose into the pallas_call input.
    patches = x.reshape(B, Cin, Hp, p, Wp, p)
    patches = jnp.transpose(patches, (0, 2, 4, 1, 3, 5))          # (B, Hp, Wp, Cin, p, p)
    patches = patches.reshape(M, K)                               # (M, K=48)

    # conv weight (C, Cin, p, p) -> (K, C) so that out = patches @ w_mat + bias
    w_mat = conv_w.reshape(C, K).T                                # (K, C)
    b_row = conv_b.reshape(1, C)
    g_row = ln_gamma.reshape(1, C)
    beta_row = ln_beta.reshape(1, C)

    # Tile over M so Pallas double-buffers the row DMAs (block_m is a multiple of 8;
    # if M is smaller than a tile we use the full extent, which is always legal).
    tm = M if M <= block_m else block_m
    grid_m = pl.cdiv(M, tm)

    out_flat = pl.pallas_call(
        swin_embedding_kernel,
        out_shape=jax.ShapeDtypeStruct((M, C), x.dtype),
        grid=(grid_m,),
        in_specs=[
            pl.BlockSpec((tm, K), lambda i: (i, 0)),   # patches: tiled over M
            pl.BlockSpec((K, C), lambda i: (0, 0)),    # weight: resident
            pl.BlockSpec((1, C), lambda i: (0, 0)),    # bias:   resident
            pl.BlockSpec((1, C), lambda i: (0, 0)),    # gamma:  resident
            pl.BlockSpec((1, C), lambda i: (0, 0)),    # beta:   resident
        ],
        out_specs=pl.BlockSpec((tm, C), lambda i: (i, 0)),
        compiler_params=pltpu.CompilerParams(
            dimension_semantics=("parallel",),         # shard M across TCs (v7x megacore)
            vmem_limit_bytes=32 * 1024 * 1024,         # safe on v5e/v6e/v7x, lots of headroom
            allow_input_fusion=[True, False, False, False, False],
        ),
    )(patches, w_mat, b_row, g_row, beta_row)

    return out_flat.reshape(B, Hp * Wp, C)


def _reference(x, conv_w, conv_b, ln_gamma, ln_beta, patch_size=4):
    """Pure-JAX reference matching the PyTorch module forward."""
    y = jax.lax.conv_general_dilated(
        x, conv_w,
        window_strides=(patch_size, patch_size),
        padding="VALID",
        dimension_numbers=("NCHW", "OIHW", "NCHW"),
    ) + conv_b[None, :, None, None]
    B, C, Hp, Wp = y.shape
    y = jnp.transpose(y, (0, 2, 3, 1)).reshape(B, Hp * Wp, C)      # b (h w) c
    mean = jnp.mean(y, axis=-1, keepdims=True)
    var = jnp.mean((y - mean) ** 2, axis=-1, keepdims=True)
    y = (y - mean) / jnp.sqrt(var + 1e-5) * ln_gamma + ln_beta
    return jnp.maximum(y, 0.0)


if __name__ == "__main__":
    key = jax.random.PRNGKey(0)
    k_x, k_w, k_b, k_g, k_beta = jax.random.split(key, 5)

    B, Cin, H, W = 2, 3, 16, 16     # small spatial, 3 input channels (required by conv)
    patch_size, C = 4, 96           # module defaults

    x = jax.random.normal(k_x, (B, Cin, H, W), dtype=jnp.float32)
    conv_w = jax.random.normal(k_w, (C, Cin, patch_size, patch_size), dtype=jnp.float32) * 0.05
    conv_b = jax.random.normal(k_b, (C,), dtype=jnp.float32) * 0.05
    ln_gamma = 1.0 + 0.1 * jax.random.normal(k_g, (C,), dtype=jnp.float32)
    ln_beta = 0.1 * jax.random.normal(k_beta, (C,), dtype=jnp.float32)

    out = swin_embedding(x, conv_w, conv_b, ln_gamma, ln_beta, patch_size)
    out = jax.block_until_ready(out)

    ref = _reference(x, conv_w, conv_b, ln_gamma, ln_beta, patch_size)
    assert out.shape == (B, (H // patch_size) * (W // patch_size), C), out.shape
    assert jnp.allclose(out, ref, atol=1e-4, rtol=1e-4), float(jnp.max(jnp.abs(out - ref)))

    print("KERNEL_OK")
</pallas_src>

<mosaic_0001>
module attributes {stable_mosaic.version = 11 : i64} {
  func.func @swin_embedding_kernel(%arg0: i32, %arg1: memref<32x48xf32, #tpu.memory_space<vmem>>, %arg2: memref<48x96xf32, #tpu.memory_space<vmem>>, %arg3: memref<1x96xf32, #tpu.memory_space<vmem>>, %arg4: memref<1x96xf32, #tpu.memory_space<vmem>>, %arg5: memref<1x96xf32, #tpu.memory_space<vmem>>, %arg6: memref<32x96xf32, #tpu.memory_space<vmem>>) attributes {dimension_semantics = [#tpu.dimension_semantics<parallel>], iteration_bounds = array<i64: 1>, scalar_prefetch = 0 : i64, scratch_operands = 0 : i64, tpu.core_type = #tpu.core_type<tc>, window_params = [{transform_indices = @transform_0, window_bounds = array<i64: 32, 48>}, {pipeline_mode = #tpu.pipeline_mode<synchronous>, transform_indices = @transform_1, window_bounds = array<i64: 48, 96>}, {pipeline_mode = #tpu.pipeline_mode<synchronous>, transform_indices = @transform_2, window_bounds = array<i64: 1, 96>}, {pipeline_mode = #tpu.pipeline_mode<synchronous>, transform_indices = @transform_3, window_bounds = array<i64: 1, 96>}, {pipeline_mode = #tpu.pipeline_mode<synchronous>, transform_indices = @transform_4, window_bounds = array<i64: 1, 96>}, {transform_indices = @transform_5, window_bounds = array<i64: 32, 96>}]} {
    %c0 = arith.constant 0 : index
    %c0_0 = arith.constant 0 : index
    %0 = vector.load %arg1[%c0, %c0_0] : memref<32x48xf32, #tpu.memory_space<vmem>>, vector<32x48xf32>
    %c0_1 = arith.constant 0 : index
    %c0_2 = arith.constant 0 : index
    %1 = vector.load %arg2[%c0_1, %c0_2] : memref<48x96xf32, #tpu.memory_space<vmem>>, vector<48x96xf32>
    %cst = arith.constant dense<0.000000e+00> : vector<32x96xf32>
    %2 = tpu.matmul %0, %1, %cst {dimension_numbers = #tpu.dot_dimension_numbers<[1], [0], [0], [1], [0, 0, 1, 1], [], []>} : vector<32x48xf32>, vector<48x96xf32>, vector<32x96xf32> -> vector<32x96xf32>
    %c0_3 = arith.constant 0 : index
    %c0_4 = arith.constant 0 : index
    %3 = vector.load %arg3[%c0_3, %c0_4] : memref<1x96xf32, #tpu.memory_space<vmem>>, vector<1x96xf32>
    %4 = vector.broadcast %3 : vector<1x96xf32> to vector<32x96xf32>
    %5 = arith.addf %2, %4 : vector<32x96xf32>
    %cst_5 = arith.constant dense<0.000000e+00> : vector<32xf32>
    %6 = vector.multi_reduction <add>, %5, %cst_5 [1] : vector<32x96xf32> to vector<32xf32>
    %7 = vector.shape_cast %6 : vector<32xf32> to vector<32x1xf32>
    %cst_6 = arith.constant 9.600000e+01 : f32
    %8 = vector.broadcast %cst_6 : f32 to vector<32x1xf32>
    %9 = arith.divf %7, %8 : vector<32x1xf32>
    %10 = vector.broadcast %9 : vector<32x1xf32> to vector<32x96xf32>
    %11 = arith.subf %5, %10 : vector<32x96xf32>
    %12 = arith.mulf %11, %11 : vector<32x96xf32>
    %cst_7 = arith.constant dense<0.000000e+00> : vector<32xf32>
    %13 = vector.multi_reduction <add>, %12, %cst_7 [1] : vector<32x96xf32> to vector<32xf32>
    %14 = vector.shape_cast %13 : vector<32xf32> to vector<32x1xf32>
    %cst_8 = arith.constant 9.600000e+01 : f32
    %15 = vector.broadcast %cst_8 : f32 to vector<32x1xf32>
    %16 = arith.divf %14, %15 : vector<32x1xf32>
    %cst_9 = arith.constant 9.99999974E-6 : f32
    %17 = vector.broadcast %cst_9 : f32 to vector<32x1xf32>
    %18 = arith.addf %16, %17 : vector<32x1xf32>
    %19 = math.rsqrt %18 : vector<32x1xf32>
    %20 = vector.broadcast %19 : vector<32x1xf32> to vector<32x96xf32>
    %21 = arith.mulf %11, %20 : vector<32x96xf32>
    %c0_10 = arith.constant 0 : index
    %c0_11 = arith.constant 0 : index
    %22 = vector.load %arg4[%c0_10, %c0_11] : memref<1x96xf32, #tpu.memory_space<vmem>>, vector<1x96xf32>
    %23 = vector.broadcast %22 : vector<1x96xf32> to vector<32x96xf32>
    %24 = arith.mulf %21, %23 : vector<32x96xf32>
    %c0_12 = arith.constant 0 : index
    %c0_13 = arith.constant 0 : index
    %25 = vector.load %arg5[%c0_12, %c0_13] : memref<1x96xf32, #tpu.memory_space<vmem>>, vector<1x96xf32>
    %26 = vector.broadcast %25 : vector<1x96xf32> to vector<32x96xf32>
    %27 = arith.addf %24, %26 : vector<32x96xf32>
    %cst_14 = arith.constant 0.000000e+00 : f32
    %28 = vector.broadcast %cst_14 : f32 to vector<32x96xf32>
    %29 = arith.maximumf %27, %28 : vector<32x96xf32>
    %c0_15 = arith.constant 0 : index
    %c0_16 = arith.constant 0 : index
    %30 = vector.load %arg6[%c0_15, %c0_16] : memref<32x96xf32, #tpu.memory_space<vmem>>, vector<32x96xf32>
    tpu.vector_store %arg6[%c0_15, %c0_16], %29 {strides = array<i32>} : memref<32x96xf32, #tpu.memory_space<vmem>>, vector<32x96xf32>,
    return
  }
  func.func @transform_0(%arg0: i32) -> (i32, i32) {
    %c0_i32 = arith.constant 0 : i32
    %c0_i32_0 = arith.constant 0 : i32
    return %arg0, %c0_i32 : i32, i32
  }
  func.func @transform_1(%arg0: i32) -> (i32, i32) {
    %c0_i32 = arith.constant 0 : i32
    %c0_i32_0 = arith.constant 0 : i32
    %c0_i32_1 = arith.constant 0 : i32
    return %c0_i32, %c0_i32_0 : i32, i32
  }
  func.func @transform_2(%arg0: i32) -> (i32, i32) {
    %c0_i32 = arith.constant 0 : i32
    %c0_i32_0 = arith.constant 0 : i32
    %c0_i32_1 = arith.constant 0 : i32
    return %c0_i32, %c0_i32_0 : i32, i32
  }
  func.func @transform_3(%arg0: i32) -> (i32, i32) {
    %c0_i32 = arith.constant 0 : i32
    %c0_i32_0 = arith.constant 0 : i32
    %c0_i32_1 = arith.constant 0 : i32
    return %c0_i32, %c0_i32_0 : i32, i32
  }
  func.func @transform_4(%arg0: i32) -> (i32, i32) {
    %c0_i32 = arith.constant 0 : i32
    %c0_i32_0 = arith.constant 0 : i32
    %c0_i32_1 = arith.constant 0 : i32
    return %c0_i32, %c0_i32_0 : i32, i32
  }
  func.func @transform_5(%arg0: i32) -> (i32, i32) {
    %c0_i32 = arith.constant 0 : i32
    %c0_i32_0 = arith.constant 0 : i32
    return %arg0, %c0_i32 : i32, i32
  }
}

</mosaic_0001>

<bundles_post_ra>
// kernel: tpu_custom_call.1
= control target key start
LH: loop header
LB: loop body
LE: loop exit
PB: predicated region body
PF: predicated region fallthrough
CT: control target
= control target key end

     0   :  { %10 = vsyncpa [#allocation3], 0  ;;  %s509_s0 = inlined_call_operand.hbm [shape: f32[32,48], index: 0, kind: input, shape index: {}]   ;;  %s510_s1 = inlined_call_operand.hbm [shape: f32[48,96], index: 1, kind: input, shape index: {}]   ;;  %s511_s2 = inlined_call_operand.vmem [shape: f32[1,96], index: 2, kind: input, shape index: {}]   ;;  %s512_s3 = inlined_call_operand.vmem [shape: f32[1,96], index: 3, kind: input, shape index: {}]   ;;  %s513_s4 = inlined_call_operand.vmem [shape: f32[1,96], index: 4, kind: input, shape index: {}]   ;;  %s514_s5 = inlined_call_operand.hbm [shape: f32[32,96], index: 5, kind: output, shape index: {}]  }
   0x1   :  { %11 = vsyncpa [#allocation6], 0 }
   0x2   :  { %12 = vsyncpa [#allocation4], 0  ;;  %s404_s18 = smov [#allocation2]   ;;  %s332_s22 = scalar_lea.hbm %s509_s0, 512 }
   0x3   :  { %s18_s19 = sshll.u32 %s404_s18, 4  ;;  %p333_p0 = scmp.ne.s32.totalorder %s509_s0, %s332_s22  ;;  %s19_s19 = int_to_ptr.vmem [resolvable:$true] %s18_s19 }
   0x4   :  { %p336_p1 = scmp.lt.u32.totalorder %s332_s22, %s509_s0 }
   0x6   :  { %p338_p2 = pnand %p336_p1, %p333_p0 }
   0x8   :  { %341 = shalt.err (!%p338_p2)
}
   0x9   :  { %s342_s27 = scalar_lea.vmem %s19_s19, 512  ;;  %p347_p4 = scmp.lt.s32.totalorder %s19_s19, %s19_s19 }
   0xa   :  { %p343_p3 = scmp.ne.s32.totalorder %s19_s19, %s342_s27  ;;  %p348_p5 = scmp.lt.s32.totalorder %s342_s27, %s342_s27 }
   0xc   :  { %p349_p6 = por %p348_p5, %p347_p4 }
   0xe   :  { %p350_p7 = pnand %p349_p6, %p343_p3 }
  0x10   :  { %353 = shalt.err (!%p350_p7)
}
  0x11   :  { %s405_s28 = smov 128   ;;  %s406_s29 = smov 8  }
  0x12   :  { %24 = dma.hbm_to_vmem [thread:$0]  %s509_s0, 512, %s19_s19, [#allocation3], %s405_s28, %s405_s28, %s406_s29  }
  0x13   :  { %s407_s7 = smov [#allocation5]   ;;  %s354_s11 = scalar_lea.hbm %s510_s1, 768 }
  0x14   :  { %s30_s8 = sshll.u32 %s407_s7, 4  ;;  %p355_p8 = scmp.ne.s32.totalorder %s510_s1, %s354_s11  ;;  %s31_s8 = int_to_ptr.vmem [resolvable:$true] %s30_s8 }
  0x15   :  { %p358_p9 = scmp.lt.u32.totalorder %s354_s11, %s510_s1 }
  0x17   :  { %p360_p10 = pnand %p358_p9, %p355_p8 }
  0x19   :  { %363 = shalt.err (!%p360_p10)
}
  0x1a   :  { %s364_s16 = scalar_lea.vmem %s31_s8, 768  ;;  %p369_p12 = scmp.lt.s32.totalorder %s31_s8, %s31_s8 }
  0x1b   :  { %p365_p11 = scmp.ne.s32.totalorder %s31_s8, %s364_s16  ;;  %p370_p13 = scmp.lt.s32.totalorder %s364_s16, %s364_s16 }
  0x1d   :  { %p371_p0 = por %p370_p13, %p369_p12 }
  0x1f   :  { %p372_p1 = pnand %p371_p0, %p365_p11 }
  0x21   :  { %375 = shalt.err (!%p372_p1)
}
  0x22   :  { %36 = dma.hbm_to_vmem [thread:$0]  %s510_s1, 768, %s31_s8, [#allocation6], %s405_s28, %s405_s28, %s406_s29  }
  0x23   :  { %398 = dma.done.wait [#allocation3], 512  }
  0x24   :  { %399 = vsyncadd [#allocation3], 4294966784 }
  0x25   :  { %400 = dma.done.wait [#allocation6], 768  }
  0x26   :  { %401 = vsyncadd [#allocation6], 4294966528  ;;  %v53_v0 = vld [vmem:[#allocation5] sm:$0xff]  ;;  %v54_v1 = vld [vmem:[#allocation5 + $0x8] sm:$0xff]  ;;  %vm66_vm0 = vcmask 392192   ;;  %vm164_vm1 = vcmask 785408  }
  0x27   :  { %v55_v2 = vld [vmem:[#allocation5 + $0x10] sm:$0xff]  ;;  %v301_v3 = vpack.c.bf16 %v54_v1, %v53_v0  ;;  %v56_v4 = vld [vmem:[#allocation5 + $0x18] sm:$0xff]  ;;  %v57_v6 = vld [vmem:[#allocation5 + $0x20] sm:$0xff] }
  0x28   :  { %v305_v5 = vpack.c.bf16 %v56_v4, %v55_v2  ;;  %v58_v7 = vld [vmem:[#allocation5 + $0x28] sm:$0xff]  ;;  %v49_v8 = vld [vmem:[#allocation2] sm:$0xff]  ;;  %v51_v9 = vld [vmem:[#allocation2 + $0x10] sm:$0xff] }
  0x29   :  { %302 = vmatprep.subr.bf16.mxu0 %v301_v3  ;;  %313 = vmatprep.subr.bf16.mxu1 %v301_v3  ;;  %v309_v10 = vpack.c.bf16 %v58_v7, %v57_v6  ;;  %v50_v11 = vld [vmem:[#allocation2 + $0x8] sm:$0xff]  ;;  %v52_v12 = vld [vmem:[#allocation2 + $0x18] sm:$0xff]  ;;  %v266_v13 = vld [vmem:[%s511_s2] ss:$0 sm:$0xff] }
  0x2a   :  { %304 = vmatpush3.bf16.msra.mxu0 %v301_v3  ;;  %316 = vmatpush3.bf16.msra.mxu1 %v301_v3  ;;  %v271_v59 = vld [vmem:[%s512_s3] ss:$0 sm:$0xff]  ;;  %s408_s3 = smov [#allocation7]  }
  0x2b   :  { %306 = vmatprep.subr.bf16.mxu0 %v305_v5  ;;  %314 = vmatprep.subr.bf16.mxu1 %v305_v5  ;;  %v272_v61 = vld [vmem:[%s513_s4] ss:$0 sm:$0xff]  ;;  %s253_s4 = sshll.u32 %s408_s3, 4  ;;  %s254_s4 = int_to_ptr.vmem [resolvable:$true] %s253_s4 }
  0x2c   :  { %295 = vmatprep.mubr.msk.f32.mxu0 %vm66_vm0, %v49_v8  ;;  %298 = vmatprep.mubr.msk.f32.mxu1 %vm66_vm0, %v51_v9  ;;  %s376_s22 = scalar_lea.vmem %s254_s4, 512  ;;  %p381_p3 = scmp.lt.s32.totalorder %s254_s4, %s254_s4 }
  0x2d   :  { %p377_p2 = scmp.ne.s32.totalorder %s254_s4, %s376_s22  ;;  %p382_p4 = scmp.lt.s32.totalorder %s376_s22, %s376_s22 }
  0x2e   :  { %308 = vmatpush3.bf16.msra.mxu0 %v305_v5  ;;  %317 = vmatpush3.bf16.msra.mxu1 %v305_v5 }
  0x2f   :  { %310 = vmatprep.subr.bf16.mxu0 %v309_v10  ;;  %315 = vmatprep.subr.bf16.mxu1 %v309_v10  ;;  %p383_p5 = por %p382_p4, %p381_p3 }
  0x31   :  { %p384_p6 = pnand %p383_p5, %p377_p2 }
  0x32   :  { %312 = vmatpush3.bf16.msra.mxu0 %v309_v10  ;;  %318 = vmatpush3.bf16.msra.mxu1 %v309_v10 }
  0x35   :  { %296 = vmatmul.mubr.msk.f32.vlgmr.msra.gmra.mrb[0].mxu0 %vm66_vm0, %v50_v11  ;;  %299 = vmatmul.mubr.msk.f32.vlgmr.msra.gmra.mrb[0].mxu1 %vm66_vm0, %v52_v12 }
 0x108   :  { %v297_v14 = vpop.f32.mrb[0].mxu0  ;;  %v300_v15 = vpop.f32.mrb[0].mxu1 }
 0x109   :  { %v145_v16 = vpop.f32.mrb[1].mxu0  ;;  %v155_v17 = vpop.f32.mrb[1].mxu1  ;;  %v161_v18 = vadd.f32 %v300_v15, %v266_v13  ;;  %v151_v21 = vadd.f32 %v297_v14, %v266_v13 }
 0x10a   :  { %v146_v19 = vadd.f32 %v266_v13, %v145_v16  ;;  %v156_v20 = vadd.f32 %v266_v13, %v155_v17 }
 0x10b   :  { %v174_v24 = vsel %vm164_vm1, %v161_v18, 0.0  ;;  %v168_v25 = vsel %vm164_vm1, %v151_v21, 0.0 }
 0x10c   :  { %v171_v22 = vsel %vm164_vm1, %v156_v20, 0.0  ;;  %v165_v23 = vsel %vm164_vm1, %v146_v19, 0.0 }
 0x10d   :  { %172 = vadd.xlane.f32.xlu1 %v171_v22  ;;  %166 = vadd.xlane.f32.xlu0 %v165_v23 }
 0x111   :  { %175 = vadd.xlane.f32.xlu1 %v174_v24  ;;  %169 = vadd.xlane.f32.xlu0 %v168_v25 }
 0x19a   :  { %v173_v26 = vpop.xlane.xlu1 %172  ;;  %v167_v27 = vpop.xlane.xlu0 %166 }
 0x19b   :  { %v180_v28 = vmul.f32 0.010416667, %v173_v26  ;;  %v178_v29 = vmul.f32 0.010416667, %v167_v27 }
 0x19d   :  { %v184_v30 = vsub.f32 %v156_v20, %v180_v28  ;;  %v182_v31 = vsub.f32 %v146_v19, %v178_v29 }
 0x19e   :  { %v176_v32 = vpop.xlane.xlu1 %175  ;;  %v170_v33 = vpop.xlane.xlu0 %169 }
 0x19f   :  { %v181_v34 = vmul.f32 0.010416667, %v176_v32  ;;  %v179_v35 = vmul.f32 0.010416667, %v170_v33  ;;  %v186_v36 = vmul.f32 %v182_v31, %v182_v31  ;;  %v188_v40 = vmul.f32 %v184_v30, %v184_v30 }
 0x1a1   :  { %v185_v37 = vsub.f32 %v161_v18, %v181_v34  ;;  %v183_v38 = vsub.f32 %v151_v21, %v179_v35  ;;  %v190_v39 = vsel %vm164_vm1, %v186_v36, 0.0  ;;  %v196_v42 = vsel %vm164_vm1, %v188_v40, 0.0 }
 0x1a2   :  { %191 = vadd.xlane.f32.xlu0 %v190_v39 }
 0x1a3   :  { %v187_v41 = vmul.f32 %v183_v38, %v183_v38  ;;  %v189_v44 = vmul.f32 %v185_v37, %v185_v37 }
 0x1a5   :  { %v193_v43 = vsel %vm164_vm1, %v187_v41, 0.0  ;;  %v199_v45 = vsel %vm164_vm1, %v189_v44, 0.0 }
 0x1a6   :  { %197 = vadd.xlane.f32.xlu0 %v196_v42  ;;  %194 = vadd.xlane.f32.xlu1 %v193_v43 }
 0x1aa   :  { %200 = vadd.xlane.f32.xlu1 %v199_v45 }
 0x22f   :  { %v192_v46 = vpop.xlane.xlu0 %191 }
 0x230   :  { %v202_v47 = vmul.f32 0.010416667, %v192_v46 }
 0x232   :  { %v206_v48 = vadd.f32 1e-05, %v202_v47 }
 0x233   :  { %v195_v49 = vpop.xlane.xlu1 %194  ;;  %v198_v50 = vpop.xlane.xlu0 %197 }
 0x234   :  { %324 = vrsqrt.f32 %v206_v48  ;;  %v203_v51 = vmul.f32 0.010416667, %v195_v49  ;;  %v204_v52 = vmul.f32 0.010416667, %v198_v50 }
 0x236   :  { %v207_v53 = vadd.f32 1e-05, %v203_v51  ;;  %v208_v54 = vadd.f32 1e-05, %v204_v52 }
 0x237   :  { %v201_v55 = vpop.xlane.xlu1 %200 }
 0x238   :  { %326 = vrsqrt.f32 %v207_v53  ;;  %v205_v56 = vmul.f32 0.010416667, %v201_v55 }
 0x239   :  { %328 = vrsqrt.f32 %v208_v54 }
 0x23a   :  { %v209_v57 = vadd.f32 1e-05, %v205_v56 }
 0x23c   :  { %330 = vrsqrt.f32 %v209_v57 }
 0x23e   :  { %v325_v58 = vpop.eup %324 }
 0x23f   :  { %v214_v60 = vmul.f32 %v325_v58, %v182_v31 }
 0x241   :  { %v225_v62 = vmul.f32 %v271_v59, %v214_v60 }
 0x242   :  { %v327_v63 = vpop.eup %326 }
 0x243   :  { %v329_v0 = vpop.eup %328  ;;  %v215_v1 = vmul.f32 %v327_v63, %v183_v38  ;;  %v236_v2 = vadd.f32 %v272_v61, %v225_v62 }
 0x244   :  { %v216_v3 = vmul.f32 %v329_v0, %v184_v30 }
 0x245   :  { %v226_v4 = vmul.f32 %v271_v59, %v215_v1  ;;  %v240_v5 = vmax.f32 %v236_v2, 0.0 }
 0x246   :  { %v331_v6 = vpop.eup %330  ;;  %v227_v7 = vmul.f32 %v271_v59, %v216_v3 }
 0x247   :  { %v217_v8 = vmul.f32 %v331_v6, %v185_v37  ;;  %v237_v9 = vadd.f32 %v272_v61, %v226_v4  ;;  %244 = vst.msk [vmem:[#allocation7] sm:$0xff] %vm164_vm1, %v240_v5 }
 0x248   :  { %v238_v10 = vadd.f32 %v272_v61, %v227_v7 }
 0x249   :  { %v228_v11 = vmul.f32 %v271_v59, %v217_v8  ;;  %v241_v12 = vmax.f32 %v237_v9, 0.0 }
 0x24a   :  { %v242_v13 = vmax.f32 %v238_v10, 0.0 }
 0x24b   :  { %v239_v14 = vadd.f32 %v272_v61, %v228_v11  ;;  %245 = vst.msk [vmem:[#allocation7 + $0x8] sm:$0xff] %vm164_vm1, %v241_v12 }
 0x24c   :  { %246 = vst.msk [vmem:[#allocation7 + $0x10] sm:$0xff] %vm164_vm1, %v242_v13 }
 0x24d   :  { %v243_v15 = vmax.f32 %v239_v14, 0.0 }
 0x24f   :  { %247 = vst.msk [vmem:[#allocation7 + $0x18] sm:$0xff] %vm164_vm1, %v243_v15 }
 0x250   :  { %387 = shalt.err (!%p384_p6)
}
 0x251   :  { %s388_s25 = scalar_lea.hbm %s514_s5, 512 }
 0x252   :  { %p389_p7 = scmp.ne.s32.totalorder %s514_s5, %s388_s25  ;;  %p392_p8 = scmp.lt.u32.totalorder %s388_s25, %s514_s5 }
 0x254   :  { %p394_p9 = pnand %p392_p8, %p389_p7 }
 0x256   :  { %397 = shalt.err (!%p394_p9)
}
 0x257   :  { %259 = dma.vmem_to_hbm [thread:$0]  %s254_s4, 512, %s514_s5, [#allocation4], %s405_s28, %s405_s28, %s406_s29  }
 0x258   :  { %402 = dma.done.wait [#allocation4], 512  }
 0x259   :  { %403 = vsyncadd [#allocation4], 4294966784 }
 0x25a   :  { %263 = vsyncpa [#allocation3], 1 }
 0x25b   :  { %264 = vsyncpa [#allocation6], 1 }
 0x25c   :  { %265 = vsyncpa [#allocation4], 1 }

</bundles_post_ra>
